<compile_context>
chip_gen: v7x
topology: tpu7x:2x2x1
jax: 0.10.0
libtpu: 0.0.40
codegen_flags: <defaults>
</compile_context>

<pallas_src>
import functools

import jax
import jax.numpy as jnp
from jax.experimental import pallas as pl
from jax.experimental.pallas import tpu as pltpu


# ---------------------------------------------------------------------------
# Kernel: fused 3-layer MLP, feature-major (batch on the 128-lane axis).
#   xT : [4,  TB] f32      W1: [64, 4]   b1: [64, 1]
#                          W2: [32, 64]  b2: [32, 1]
#                          W3: [3,  32]  b3: [3,  1]
#   outT: [3, TB] f32
# ---------------------------------------------------------------------------
def mlp_kernel(x_ref, w1_ref, b1_ref, w2_ref, b2_ref, w3_ref, b3_ref, o_ref):
    x = x_ref[...]
    # Layer 1: Linear(4 -> 64) + ReLU  (W @ x, f32 MXU accumulation)
    h1 = jnp.dot(w1_ref[...], x, preferred_element_type=jnp.float32)
    h1 = jnp.maximum(h1 + b1_ref[...], 0.0)
    # Layer 2: Linear(64 -> 32) + ReLU
    h2 = jnp.dot(w2_ref[...], h1, preferred_element_type=jnp.float32)
    h2 = jnp.maximum(h2 + b2_ref[...], 0.0)
    # Layer 3: Linear(32 -> 3), no activation
    out = jnp.dot(w3_ref[...], h2, preferred_element_type=jnp.float32) + b3_ref[...]
    o_ref[...] = out.astype(o_ref.dtype)


def _cdiv(a, b):
    return -(-a // b)


def _round_up(x, m):
    return _cdiv(x, m) * m


def _choose_tiling(B, tb_max):
    """Pick (tb, Bp, n_steps): lane-aligned tile, bounded padding, >=2 even steps
    when there is enough work (so v7x's two TensorCores both get batch shards)."""
    B128 = _round_up(max(B, 1), 128)
    tb_max = max(128, (tb_max // 128) * 128)
    n_steps = _cdiv(B128, tb_max)
    if B128 >= 256:                      # enough work to split across two TCs
        n_steps = max(n_steps, 2)
        n_steps += n_steps % 2           # even step count balances the cores
    tb = _round_up(_cdiv(B128, n_steps), 128)
    Bp = n_steps * tb                    # pad bounded by ~n_steps*128 columns
    return tb, Bp, n_steps


def _run_mlp_fm(xT_padded, params, tb, n_steps):
    """xT_padded: [F_in, Bp] f32 (Bp = n_steps * tb) -> [3, Bp] f32."""
    w1, b1, w2, b2, w3, b3 = params
    F_in, Bp = xT_padded.shape
    # Weights/biases use constant block indices: DMA'd once, resident in VMEM.
    const = lambda a: pl.BlockSpec(a.shape, lambda i: (0, 0))
    return pl.pallas_call(
        mlp_kernel,
        out_shape=jax.ShapeDtypeStruct((3, Bp), jnp.float32),
        grid=(n_steps,),
        in_specs=[
            pl.BlockSpec((F_in, tb), lambda i: (0, i)),   # streamed activations
            const(w1), const(b1),
            const(w2), const(b2),
            const(w3), const(b3),
        ],
        out_specs=pl.BlockSpec((3, tb), lambda i: (0, i)),  # lane-dense output slab
        compiler_params=pltpu.CompilerParams(
            dimension_semantics=("parallel",),               # megacore split on v7x
            vmem_limit_bytes=32 * 1024 * 1024,               # headroom for big tiles on v5e
        ),
    )(xT_padded, w1, b1, w2, b2, w3, b3)


@functools.partial(jax.jit, static_argnames=("tb_max",))
def simple_request_generator_fm(xT, params, *, tb_max=8192):
    """Feature-major fast path: xT [4, B] f32 -> [3, B] f32 (no wrapper relayouts)."""
    _, B = xT.shape
    tb, Bp, n_steps = _choose_tiling(B, tb_max)
    xT = xT.astype(jnp.float32)
    if Bp != B:
        xT = jnp.pad(xT, ((0, 0), (0, Bp - B)))
    outT = _run_mlp_fm(xT, params, tb, n_steps)
    return outT[:, :B] if Bp != B else outT


@functools.partial(jax.jit, static_argnames=("tb_max",))
def simple_request_generator(x, params, *, tb_max=8192):
    """PyTorch-compatible wrapper: x [B, 4] f32 -> [B, 3] f32."""
    B, F_in = x.shape
    tb, Bp, n_steps = _choose_tiling(B, tb_max)
    xT = x.T.astype(jnp.float32)          # feature-major slab (batch -> lanes)
    if Bp != B:
        xT = jnp.pad(xT, ((0, 0), (0, Bp - B)))
    outT = _run_mlp_fm(xT, params, tb, n_steps)
    return outT[:, :B].T


def init_params(key):
    """Deterministic init matching nn.Linear: W [out, in], b [out, 1]."""
    dims = [(4, 64), (64, 32), (32, 3)]
    params = []
    for fan_in, fan_out in dims:
        kw, kb, key = jax.random.split(key, 3)
        bound = 1.0 / (fan_in ** 0.5)
        w = jax.random.uniform(kw, (fan_out, fan_in), jnp.float32, -bound, bound)
        b = jax.random.uniform(kb, (fan_out, 1), jnp.float32, -bound, bound)
        params += [w, b]
    return tuple(params)


def reference_mlp(x, params):
    """Plain-JAX f32 reference matching the nn.Module forward."""
    w1, b1, w2, b2, w3, b3 = params
    h = jnp.maximum(x @ w1.T + b1.T, 0.0)
    h = jnp.maximum(h @ w2.T + b2.T, 0.0)
    return h @ w3.T + b3.T


if __name__ == "__main__":
    key = jax.random.PRNGKey(0)
    kx, kp = jax.random.split(key)
    params = init_params(kp)

    # Small batch-major test (PyTorch-style [B, 4] -> [B, 3]).
    B = 8
    x = jax.random.normal(kx, (B, 4), jnp.float32)
    out = jax.block_until_ready(simple_request_generator(x, params))
    ref = reference_mlp(x, params)
    assert out.shape == (B, 3), out.shape
    assert jnp.allclose(out, ref, atol=1e-4, rtol=1e-4), "f32 mismatch vs reference"

    # Ragged batch with a multi-step grid (>=2 even steps -> both v7x TCs busy).
    B2 = 300
    x2 = jax.random.normal(kx, (B2, 4), jnp.float32)
    out2 = jax.block_until_ready(simple_request_generator(x2, params, tb_max=128))
    ref2 = reference_mlp(x2, params)
    assert out2.shape == (B2, 3), out2.shape
    assert jnp.allclose(out2, ref2, atol=1e-4, rtol=1e-4), "multi-tile mismatch"

    # Feature-major fast path: no wrapper transpose/pad HBM passes.
    out3 = jax.block_until_ready(simple_request_generator_fm(x2.T, params, tb_max=128))
    assert out3.shape == (3, B2), out3.shape
    assert jnp.allclose(out3.T, ref2, atol=1e-4, rtol=1e-4), "feature-major mismatch"

    print("KERNEL_OK")
</pallas_src>

<mosaic_0001>
module attributes {stable_mosaic.version = 11 : i64} {
  func.func @mlp_kernel(%arg0: i32, %arg1: memref<4x128xf32, #tpu.memory_space<vmem>>, %arg2: memref<64x4xf32, #tpu.memory_space<vmem>>, %arg3: memref<64x1xf32, #tpu.memory_space<vmem>>, %arg4: memref<32x64xf32, #tpu.memory_space<vmem>>, %arg5: memref<32x1xf32, #tpu.memory_space<vmem>>, %arg6: memref<3x32xf32, #tpu.memory_space<vmem>>, %arg7: memref<3x1xf32, #tpu.memory_space<vmem>>, %arg8: memref<3x128xf32, #tpu.memory_space<vmem>>) attributes {dimension_semantics = [#tpu.dimension_semantics<parallel>], iteration_bounds = array<i64: 1>, scalar_prefetch = 0 : i64, scratch_operands = 0 : i64, tpu.core_type = #tpu.core_type<tc>, window_params = [{transform_indices = @transform_0, window_bounds = array<i64: 4, 128>}, {pipeline_mode = #tpu.pipeline_mode<synchronous>, transform_indices = @transform_1, window_bounds = array<i64: 64, 4>}, {pipeline_mode = #tpu.pipeline_mode<synchronous>, transform_indices = @transform_2, window_bounds = array<i64: 64, 1>}, {pipeline_mode = #tpu.pipeline_mode<synchronous>, transform_indices = @transform_3, window_bounds = array<i64: 32, 64>}, {pipeline_mode = #tpu.pipeline_mode<synchronous>, transform_indices = @transform_4, window_bounds = array<i64: 32, 1>}, {pipeline_mode = #tpu.pipeline_mode<synchronous>, transform_indices = @transform_5, window_bounds = array<i64: 3, 32>}, {pipeline_mode = #tpu.pipeline_mode<synchronous>, transform_indices = @transform_6, window_bounds = array<i64: 3, 1>}, {transform_indices = @transform_7, window_bounds = array<i64: 3, 128>}]} {
    %c0 = arith.constant 0 : index
    %c0_0 = arith.constant 0 : index
    %0 = vector.load %arg1[%c0, %c0_0] : memref<4x128xf32, #tpu.memory_space<vmem>>, vector<4x128xf32>
    %c0_1 = arith.constant 0 : index
    %c0_2 = arith.constant 0 : index
    %1 = vector.load %arg2[%c0_1, %c0_2] : memref<64x4xf32, #tpu.memory_space<vmem>>, vector<64x4xf32>
    %cst = arith.constant dense<0.000000e+00> : vector<64x128xf32>
    %2 = tpu.matmul %1, %0, %cst {dimension_numbers = #tpu.dot_dimension_numbers<[1], [0], [0], [1], [0, 0, 1, 1], [], []>} : vector<64x4xf32>, vector<4x128xf32>, vector<64x128xf32> -> vector<64x128xf32>
    %c0_3 = arith.constant 0 : index
    %c0_4 = arith.constant 0 : index
    %3 = vector.load %arg3[%c0_3, %c0_4] : memref<64x1xf32, #tpu.memory_space<vmem>>, vector<64x1xf32>
    %4 = vector.broadcast %3 : vector<64x1xf32> to vector<64x128xf32>
    %5 = arith.addf %2, %4 : vector<64x128xf32>
    %cst_5 = arith.constant 0.000000e+00 : f32
    %6 = vector.broadcast %cst_5 : f32 to vector<64x128xf32>
    %7 = arith.maximumf %5, %6 : vector<64x128xf32>
    %c0_6 = arith.constant 0 : index
    %c0_7 = arith.constant 0 : index
    %8 = vector.load %arg4[%c0_6, %c0_7] : memref<32x64xf32, #tpu.memory_space<vmem>>, vector<32x64xf32>
    %cst_8 = arith.constant dense<0.000000e+00> : vector<32x128xf32>
    %9 = tpu.matmul %8, %7, %cst_8 {dimension_numbers = #tpu.dot_dimension_numbers<[1], [0], [0], [1], [0, 0, 1, 1], [], []>} : vector<32x64xf32>, vector<64x128xf32>, vector<32x128xf32> -> vector<32x128xf32>
    %c0_9 = arith.constant 0 : index
    %c0_10 = arith.constant 0 : index
    %10 = vector.load %arg5[%c0_9, %c0_10] : memref<32x1xf32, #tpu.memory_space<vmem>>, vector<32x1xf32>
    %11 = vector.broadcast %10 : vector<32x1xf32> to vector<32x128xf32>
    %12 = arith.addf %9, %11 : vector<32x128xf32>
    %cst_11 = arith.constant 0.000000e+00 : f32
    %13 = vector.broadcast %cst_11 : f32 to vector<32x128xf32>
    %14 = arith.maximumf %12, %13 : vector<32x128xf32>
    %c0_12 = arith.constant 0 : index
    %c0_13 = arith.constant 0 : index
    %15 = vector.load %arg6[%c0_12, %c0_13] : memref<3x32xf32, #tpu.memory_space<vmem>>, vector<3x32xf32>
    %cst_14 = arith.constant dense<0.000000e+00> : vector<3x128xf32>
    %16 = tpu.matmul %15, %14, %cst_14 {dimension_numbers = #tpu.dot_dimension_numbers<[1], [0], [0], [1], [0, 0, 1, 1], [], []>} : vector<3x32xf32>, vector<32x128xf32>, vector<3x128xf32> -> vector<3x128xf32>
    %c0_15 = arith.constant 0 : index
    %c0_16 = arith.constant 0 : index
    %17 = vector.load %arg7[%c0_15, %c0_16] : memref<3x1xf32, #tpu.memory_space<vmem>>, vector<3x1xf32>
    %18 = vector.broadcast %17 : vector<3x1xf32> to vector<3x128xf32>
    %19 = arith.addf %16, %18 : vector<3x128xf32>
    %c0_17 = arith.constant 0 : index
    %c0_18 = arith.constant 0 : index
    %20 = vector.load %arg8[%c0_17, %c0_18] : memref<3x128xf32, #tpu.memory_space<vmem>>, vector<3x128xf32>
    tpu.vector_store %arg8[%c0_17, %c0_18], %19 {strides = array<i32>} : memref<3x128xf32, #tpu.memory_space<vmem>>, vector<3x128xf32>,
    return
  }
  func.func @transform_0(%arg0: i32) -> (i32, i32) {
    %c0_i32 = arith.constant 0 : i32
    %c0_i32_0 = arith.constant 0 : i32
    return %c0_i32, %arg0 : i32, i32
  }
  func.func @transform_1(%arg0: i32) -> (i32, i32) {
    %c0_i32 = arith.constant 0 : i32
    %c0_i32_0 = arith.constant 0 : i32
    %c0_i32_1 = arith.constant 0 : i32
    return %c0_i32, %c0_i32_0 : i32, i32
  }
  func.func @transform_2(%arg0: i32) -> (i32, i32) {
    %c0_i32 = arith.constant 0 : i32
    %c0_i32_0 = arith.constant 0 : i32
    %c0_i32_1 = arith.constant 0 : i32
    return %c0_i32, %c0_i32_0 : i32, i32
  }
  func.func @transform_3(%arg0: i32) -> (i32, i32) {
    %c0_i32 = arith.constant 0 : i32
    %c0_i32_0 = arith.constant 0 : i32
    %c0_i32_1 = arith.constant 0 : i32
    return %c0_i32, %c0_i32_0 : i32, i32
  }
  func.func @transform_4(%arg0: i32) -> (i32, i32) {
    %c0_i32 = arith.constant 0 : i32
    %c0_i32_0 = arith.constant 0 : i32
    %c0_i32_1 = arith.constant 0 : i32
    return %c0_i32, %c0_i32_0 : i32, i32
  }
  func.func @transform_5(%arg0: i32) -> (i32, i32) {
    %c0_i32 = arith.constant 0 : i32
    %c0_i32_0 = arith.constant 0 : i32
    %c0_i32_1 = arith.constant 0 : i32
    return %c0_i32, %c0_i32_0 : i32, i32
  }
  func.func @transform_6(%arg0: i32) -> (i32, i32) {
    %c0_i32 = arith.constant 0 : i32
    %c0_i32_0 = arith.constant 0 : i32
    %c0_i32_1 = arith.constant 0 : i32
    return %c0_i32, %c0_i32_0 : i32, i32
  }
  func.func @transform_7(%arg0: i32) -> (i32, i32) {
    %c0_i32 = arith.constant 0 : i32
    %c0_i32_0 = arith.constant 0 : i32
    return %c0_i32, %arg0 : i32, i32
  }
}

</mosaic_0001>

<bundles_post_ra>
// kernel: simple_request_generator.1
= control target key start
LH: loop header
LB: loop body
LE: loop exit
PB: predicated region body
PF: predicated region fallthrough
CT: control target
= control target key end

     0   :  { %vm108_vm0 = vcmask 1043456   ;;  %vm83_vm1 = vcmask 31744   ;;  %v556_v3 = vmov 0   ;;  %vm253_vm2 = vcmask 523264   ;;  %s696_s0 = inlined_call_operand.vmem [shape: f32[4,128], index: 0, kind: input, shape index: {}]   ;;  %s697_s1 = inlined_call_operand.vmem [shape: f32[64,4], index: 1, kind: input, shape index: {}]   ;;  %s698_s2 = inlined_call_operand.vmem [shape: f32[64,1], index: 2, kind: input, shape index: {}]   ;;  %s699_s4 = inlined_call_operand.vmem [shape: f32[32,1], index: 4, kind: input, shape index: {}]   ;;  %s700_s6 = inlined_call_operand.vmem [shape: f32[3,1], index: 6, kind: input, shape index: {}]   ;;  %s701_s3 = inlined_call_operand.vmem [shape: f32[32,64], index: 3, kind: input, shape index: {}]   ;;  %s702_s5 = inlined_call_operand.vmem [shape: f32[3,32], index: 5, kind: input, shape index: {}]   ;;  %s703_s7 = inlined_call_operand.vmem [shape: f32[3,128], index: 7, kind: output, shape index: {}]  }
   0x1   :  { %v26_v0 = vld [vmem:[%s696_s0] sm:$0xf]  ;;  %v28_v2 = vld [vmem:[%s697_s1 + $0x8] sm:$0xff]  ;;  %554 = vset.pattern.permute.xlu0 %v556_v3  ;;  %555 = vset.pattern.permute.xlu1 %v556_v3  ;;  %v29_v4 = vld [vmem:[%s697_s1 + $0x10] sm:$0xff]  ;;  %v557_v63 = vmov 0.0|0.0   ;;  %vm558_vm3 = vmmov 0  }
   0x2   :  { %v27_v1 = vld [vmem:[%s697_s1] sm:$0xff]  ;;  %481 = vmatprep.subr.msk.mxu0 %vm108_vm0, %v26_v0  ;;  %v37_v6 = vld [vmem:[%s698_s2 + $0x10] sm:$0xff]  ;;  %v30_v7 = vld [vmem:[%s697_s1 + $0x18] sm:$0xff]  ;;  %vm362_vm4 = vcmask 261120  }
   0x3   :  { %483 = vmatprep.mubr.msk.f32.mxu0 %vm83_vm1, %v27_v1  ;;  %482 = vmatpush3.msk.msra.mxu0 %vm108_vm0, %v26_v0  ;;  %v35_v5 = vld [vmem:[%s698_s2] sm:$0xff]  ;;  %v36_v9 = vld [vmem:[%s698_s2 + $0x8] sm:$0xff]  ;;  %v38_v10 = vld [vmem:[%s698_s2 + $0x18] sm:$0xff]  ;;  %v559_v0 = vmov 0.0  }
   0x4   :  { %484 = vmatmul.mubr.msk.f32.vlgmr.msra.gmra.mrb[0].mxu0 %vm83_vm1, %v28_v2  ;;  %45 = vperm.xlu0 %554, %v35_v5   ;;  %v31_v8 = vld [vmem:[%s697_s1 + $0x20] sm:$0xff]  ;;  %v32_v11 = vld [vmem:[%s697_s1 + $0x28] sm:$0xff]  ;;  %v33_v12 = vld [vmem:[%s697_s1 + $0x30] sm:$0xff] }
   0x5   :  { %486 = vmatprep.mubr.msk.f32.mxu0 %vm83_vm1, %v29_v4  ;;  %55 = vperm.xlu1 %555, %v37_v6   ;;  %v39_v13 = vld [vmem:[%s698_s2 + $0x20] sm:$0xff]  ;;  %v40_v14 = vld [vmem:[%s698_s2 + $0x28] sm:$0xff]  ;;  %v34_v15 = vld [vmem:[%s697_s1 + $0x38] sm:$0xff] }
   0x6   :  { %v41_v16 = vld [vmem:[%s698_s2 + $0x30] sm:$0xff]  ;;  %v42_v17 = vld [vmem:[%s698_s2 + $0x38] sm:$0xff]  ;;  %v229_v18 = vld [vmem:[%s699_s4] sm:$0xff]  ;;  %544 = vmatprep.subr.bf16.mxu0 %v557_v63 }
   0x7   :  { %v230_v19 = vld [vmem:[%s699_s4 + $0x8] sm:$0xff]  ;;  %v231_v20 = vld [vmem:[%s699_s4 + $0x10] sm:$0xff]  ;;  %v232_v21 = vld [vmem:[%s699_s4 + $0x18] sm:$0xff] }
   0x8   :  { %487 = vmatmul.mubr.msk.f32.gmra.mrb[2].mxu0 %vm83_vm1, %v30_v7  ;;  %50 = vperm.xlu0 %554, %v36_v9   ;;  %v356_v22 = vld [vmem:[%s700_s6] sm:$0x7]  ;;  %v226_v60 = vld [vmem:[%s701_s3 + $0x8] sm:$0xff]  ;;  %v227_v61 = vld [vmem:[%s701_s3 + $0x10] sm:$0xff] }
   0x9   :  { %489 = vmatprep.mubr.msk.f32.mxu0 %vm83_vm1, %v31_v8  ;;  %60 = vperm.xlu1 %555, %v38_v10   ;;  %v225_v23 = vld [vmem:[%s701_s3] sm:$0xff]  ;;  %v228_v62 = vld [vmem:[%s701_s3 + $0x18] sm:$0xff] }
   0xa   :  { %511 = vmatprep.mubr.msk.f32.mxu1 %vm253_vm2, %v225_v23 }
   0xc   :  { %490 = vmatmul.mubr.msk.f32.gmra.mrb[4].mxu0 %vm83_vm1, %v32_v11  ;;  %65 = vperm.xlu0 %554, %v39_v13  }
   0xd   :  { %492 = vmatprep.mubr.msk.f32.mxu0 %vm83_vm1, %v33_v12  ;;  %70 = vperm.xlu1 %555, %v40_v14  }
  0x10   :  { %493 = vmatmul.mubr.msk.f32.gmra.mrb[6].mxu0 %vm83_vm1, %v34_v15  ;;  %75 = vperm.xlu0 %554, %v41_v16  }
  0x11   :  { %80 = vperm.xlu1 %555, %v42_v17   ;;  %525 = vmatprep.mubr.msk.f32.mxu0 %vm558_vm3, %v559_v0 }
  0x14   :  { %235 = vperm.xlu0 %554, %v229_v18  }
  0x15   :  { %240 = vperm.xlu1 %555, %v230_v19   ;;  %v355_v19 = vld [vmem:[%s702_s5] sm:$0x7] }
  0x18   :  { %245 = vperm.xlu0 %554, %v231_v20  }
  0x19   :  { %250 = vperm.xlu1 %555, %v232_v21  }
  0x1c   :  { %359 = vperm.xlu0 %554, %v356_v22  }
  0x83   :  { %v46_v24 = vpop.permute.xlu0 %45 }
  0x84   :  { %v56_v25 = vpop.permute.xlu1 %55 }
  0x87   :  { %v51_v26 = vpop.permute.xlu0 %50 }
  0x88   :  { %v61_v27 = vpop.permute.xlu1 %60 }
  0x8b   :  { %v66_v40 = vpop.permute.xlu0 %65 }
  0x8c   :  { %v71_v37 = vpop.permute.xlu1 %70 }
  0x8f   :  { %v76_v52 = vpop.permute.xlu0 %75 }
  0x90   :  { %v81_v49 = vpop.permute.xlu1 %80 }
  0x93   :  { %v236_v2 = vpop.permute.xlu0 %235 }
  0x94   :  { %v241_v1 = vpop.permute.xlu1 %240 }
  0x97   :  { %v246_v11 = vpop.permute.xlu0 %245 }
  0x98   :  { %v251_v8 = vpop.permute.xlu1 %250 }
  0x9b   :  { %v360_v20 = vpop.permute.xlu0 %359 }
  0xd7   :  { %v485_v28 = vpop.f32.mrb[0].mxu0 }
  0xd8   :  { %v184_v29 = vadd.f32 %v485_v28, %v51_v26  ;;  %v178_v30 = vpop.f32.mrb[1].mxu0 }
  0xd9   :  { %v179_v31 = vadd.f32 %v178_v30, %v46_v24 }
  0xda   :  { %v218_v32 = vmax.f32 %v184_v29, 0.0 }
  0xdb   :  { %v217_v33 = vmax.f32 %v179_v31, 0.0  ;;  %v488_v34 = vpop.f32.mrb[2].mxu0 }
  0xdc   :  { %v194_v35 = vadd.f32 %v488_v34, %v61_v27  ;;  %v188_v36 = vpop.f32.mrb[3].mxu0 }
  0xdd   :  { %v189_v38 = vadd.f32 %v188_v36, %v56_v25  ;;  %v528_v39 = vpack.c.bf16 %v218_v32, %v217_v33 }
  0xde   :  { %v220_v41 = vmax.f32 %v194_v35, 0.0 }
  0xdf   :  { %v219_v42 = vmax.f32 %v189_v38, 0.0  ;;  %v491_v43 = vpop.f32.mrb[4].mxu0  ;;  %529 = vmatprep.subr.bf16.mxu1 %v528_v39 }
  0xe0   :  { %v204_v44 = vadd.f32 %v491_v43, %v71_v37  ;;  %v198_v45 = vpop.f32.mrb[5].mxu0  ;;  %531 = vmatpush3.bf16.msra.mxu1 %v528_v39 }
  0xe1   :  { %v532_v46 = vpack.c.bf16 %v220_v41, %v219_v42  ;;  %v199_v47 = vadd.f32 %v198_v45, %v66_v40 }
  0xe2   :  { %v222_v48 = vmax.f32 %v204_v44, 0.0 }
  0xe3   :  { %v221_v50 = vmax.f32 %v199_v47, 0.0  ;;  %v494_v51 = vpop.f32.mrb[6].mxu0  ;;  %533 = vmatprep.subr.bf16.mxu1 %v532_v46 }
  0xe4   :  { %v214_v53 = vadd.f32 %v494_v51, %v81_v49  ;;  %v208_v54 = vpop.f32.mrb[7].mxu0  ;;  %535 = vmatpush3.bf16.msra.mxu1 %v532_v46 }
  0xe5   :  { %v536_v55 = vpack.c.bf16 %v222_v48, %v221_v50  ;;  %v209_v56 = vadd.f32 %v208_v54, %v76_v52 }
  0xe6   :  { %v224_v57 = vmax.f32 %v214_v53, 0.0 }
  0xe7   :  { %v223_v58 = vmax.f32 %v209_v56, 0.0  ;;  %537 = vmatprep.subr.bf16.mxu1 %v536_v55 }
  0xe8   :  { %539 = vmatpush3.bf16.msra.mxu1 %v536_v55 }
  0xe9   :  { %v540_v59 = vpack.c.bf16 %v224_v57, %v223_v58 }
  0xeb   :  { %541 = vmatprep.subr.bf16.mxu1 %v540_v59 }
  0xec   :  { %543 = vmatpush3.bf16.msra.mxu1 %v540_v59 }
  0xef   :  { %512 = vmatmul.mubr.msk.f32.vlgmr.msra.gmra.mrb[0].mxu1 %vm253_vm2, %v226_v60 }
  0xf0   :  { %514 = vmatprep.mubr.msk.f32.mxu1 %vm253_vm2, %v227_v61 }
  0xf3   :  { %515 = vmatmul.mubr.msk.f32.gmra.mrb[2].mxu1 %vm253_vm2, %v228_v62 }
 0x1c2   :  { %v513_v3 = vpop.f32.mrb[0].mxu1 }
 0x1c3   :  { %v338_v4 = vadd.f32 %v513_v3, %v241_v1  ;;  %v332_v5 = vpop.f32.mrb[1].mxu1 }
 0x1c4   :  { %v333_v6 = vadd.f32 %v332_v5, %v236_v2 }
 0x1c5   :  { %v352_v7 = vmax.f32 %v338_v4, 0.0 }
 0x1c6   :  { %v351_v9 = vmax.f32 %v333_v6, 0.0  ;;  %v516_v10 = vpop.f32.mrb[2].mxu1 }
 0x1c7   :  { %v348_v12 = vadd.f32 %v516_v10, %v251_v8  ;;  %v342_v13 = vpop.f32.mrb[3].mxu1 }
 0x1c8   :  { %v545_v14 = vpack.c.bf16 %v352_v7, %v351_v9  ;;  %v343_v15 = vadd.f32 %v342_v13, %v246_v11 }
 0x1c9   :  { %v354_v16 = vmax.f32 %v348_v12, 0.0 }
 0x1ca   :  { %v353_v17 = vmax.f32 %v343_v15, 0.0  ;;  %546 = vmatpush3.bf16.msra.mxu0 %v545_v14 }
 0x1cb   :  { %547 = vmatprep.subr.bf16.mxu0 %v557_v63 }
 0x1cc   :  { %v548_v18 = vpack.c.bf16 %v354_v16, %v353_v17 }
 0x1ce   :  { %549 = vmatpush3.bf16.msra.mxu0 %v548_v18 }
 0x1d1   :  { %526 = vmatmul.mubr.msk.f32.vlgmr.msra.gmra.mrb[8].mxu0 %vm362_vm4, %v355_v19 }
 0x2a4   :  { %v432_v21 = vpop.f32.mrb[8].mxu0 }
 0x2a5   :  { %v433_v22 = vadd.f32 %v432_v21, %v360_v20  ;;  %v527_v23 = vpop.f32.mrb[9].mxu0 }
 0x2a7   :  { %436 = vst [vmem:[%s703_s7] sm:$0x7] %v433_v22 }

</bundles_post_ra>
